<compile_context>
chip_gen: v7x
topology: tpu7x:2x2x1
jax: 0.10.0
libtpu: 0.0.40
codegen_flags: <defaults>
</compile_context>

<pallas_src>
import functools

import jax
import jax.numpy as jnp
from jax.experimental import pallas as pl
from jax.experimental.pallas import tpu as pltpu


_LANE = 128


def _round_up(x, m):
    return (x + m - 1) // m * m


def _vmem_budget():
    """Generation-aware VMEM byte budget (v5e/v6e: 128 MiB, v7x: 64 MiB)."""
    try:
        cap = int(pltpu.get_tpu_info().vmem_capacity_bytes)
    except Exception:  # pragma: no cover - conservative fallback
        cap = 64 * 1024 * 1024
    return max(16 << 20, min(int(cap * 0.70), cap - (12 << 20)))


# ----------------------------------------------------------------------------
# Kernel 1: per-layer projection  XW = (X @ W) * d^-1/2  (bf16 in, f32 acc)
# Tiled over node rows only; W (F_in_pad x F_out_pad) is small and resident.
# The row scaling folds the right-hand D^-1/2 of A_hat into this kernel; it
# also zeroes padded rows (their degree is 0), so padding never leaks.
# ----------------------------------------------------------------------------
def _project_kernel(x_ref, w_ref, dinv_ref, o_ref):
    xw = jnp.dot(x_ref[...], w_ref[...], preferred_element_type=jnp.float32)
    o_ref[...] = (xw * dinv_ref[...]).astype(o_ref.dtype)


def project(x, w, dinv, *, tile, vmem_limit):
    n, f_in = x.shape
    f_out = w.shape[1]
    assert n % tile == 0 and f_in % _LANE == 0 and f_out % _LANE == 0

    flops = 2 * n * f_in * f_out
    bytes_accessed = (n * f_in * 2 + f_in * f_out * 2 + n * f_out * 2 + n * 4)
    return pl.pallas_call(
        _project_kernel,
        out_shape=jax.ShapeDtypeStruct((n, f_out), jnp.bfloat16),
        grid_spec=pltpu.PrefetchScalarGridSpec(
            num_scalar_prefetch=0,
            grid=(n // tile,),
            in_specs=[
                pl.BlockSpec((tile, f_in), lambda i: (i, 0)),     # X row tile
                pl.BlockSpec((f_in, f_out), lambda i: (0, 0)),    # full W
                pl.BlockSpec((tile, 1), lambda i: (i, 0)),        # d^-1/2 rows
            ],
            out_specs=pl.BlockSpec((tile, f_out), lambda i: (i, 0)),
        ),
        compiler_params=pltpu.CompilerParams(
            dimension_semantics=("parallel",),
            vmem_limit_bytes=vmem_limit),
        cost_estimate=pl.CostEstimate(
            flops=flops, transcendentals=0, bytes_accessed=bytes_accessed),
    )(x, w, dinv)


# ----------------------------------------------------------------------------
# Kernel 2: aggregation  Z = d^-1/2 * ((A+I) @ XW) + b  (+ optional ReLU)
# A is streamed as binary int8 (half the bytes of bf16, exact 0/1 values) and
# cast to bf16 in VMEM for the MXU.  Grid = (row tiles [parallel],
# contraction tiles [arbitrary]); f32 VMEM accumulator; the left-hand D^-1/2,
# bias, ReLU and cast live in the k==last epilogue.
# If XW fits the VMEM budget it is resident (constant index_map -> one DMA);
# otherwise it streams one (tk, f_out) tile per k step.
# ----------------------------------------------------------------------------
def _aggregate_kernel(a_ref, xw_ref, dinv_ref, b_ref, o_ref, acc_ref, *,
                      apply_relu, resident, tk):
    k = pl.program_id(1)

    @pl.when(k == 0)
    def _():
        acc_ref[...] = jnp.zeros_like(acc_ref)

    a = a_ref[...].astype(jnp.bfloat16)          # exact: entries are 0/1
    if resident:
        off = pl.multiple_of(k * tk, _LANE)
        xw = xw_ref[pl.ds(off, tk), :]
    else:
        xw = xw_ref[...]
    acc_ref[...] += jnp.dot(a, xw, preferred_element_type=jnp.float32)

    @pl.when(k == pl.num_programs(1) - 1)
    def _():
        z = acc_ref[...] * dinv_ref[...] + b_ref[...]
        if apply_relu:
            z = jnp.maximum(z, 0.0)
        o_ref[...] = z.astype(o_ref.dtype)


def aggregate(a_bin, xw, dinv, b, *, apply_relu, out_dtype, tile, vmem_limit):
    n = a_bin.shape[0]
    f_out = xw.shape[1]
    tm = tk = tile
    assert n % tile == 0 and f_out % _LANE == 0
    out_isz = jnp.dtype(out_dtype).itemsize

    # VMEM footprint gate for the resident-XW path (x2 buffers, conservative).
    fixed_bytes = (2 * tm * tk               # A int8 tiles, double-buffered
                   + 2 * tm * 4              # d^-1/2 tiles
                   + 2 * f_out * 4           # bias
                   + tm * f_out * 4          # f32 accumulator scratch
                   + 2 * tm * f_out * out_isz)
    resident_bytes = 2 * n * f_out * 2       # whole XW, bf16
    resident = fixed_bytes + resident_bytes <= int(0.85 * vmem_limit)

    if resident:
        xw_spec = pl.BlockSpec((n, f_out), lambda i, k: (0, 0))
        xw_bytes = n * f_out * 2
    else:
        xw_spec = pl.BlockSpec((tk, f_out), lambda i, k: (k, 0))
        xw_bytes = (n // tm) * n * f_out * 2

    kernel = functools.partial(_aggregate_kernel, apply_relu=apply_relu,
                               resident=resident, tk=tk)
    flops = 2 * n * n * f_out
    bytes_accessed = (n * n * 1               # binary A stream (int8)
                      + xw_bytes
                      + n * f_out * out_isz
                      + n * 4 + f_out * 4)

    return pl.pallas_call(
        kernel,
        out_shape=jax.ShapeDtypeStruct((n, f_out), out_dtype),
        grid_spec=pltpu.PrefetchScalarGridSpec(
            num_scalar_prefetch=0,
            grid=(n // tm, n // tk),
            in_specs=[
                pl.BlockSpec((tm, tk), lambda i, k: (i, k)),    # A tile (int8)
                xw_spec,                                        # XW (resident or tile)
                pl.BlockSpec((tm, 1), lambda i, k: (i, 0)),     # d^-1/2 rows
                pl.BlockSpec((1, f_out), lambda i, k: (0, 0)),  # bias
            ],
            out_specs=pl.BlockSpec((tm, f_out), lambda i, k: (i, 0)),
            scratch_shapes=[pltpu.VMEM((tm, f_out), jnp.float32)],
        ),
        compiler_params=pltpu.CompilerParams(
            dimension_semantics=("parallel", "arbitrary"),
            vmem_limit_bytes=vmem_limit),
        cost_estimate=pl.CostEstimate(
            flops=flops, transcendentals=0, bytes_accessed=bytes_accessed),
    )(a_bin, xw, dinv, b)


# ----------------------------------------------------------------------------
# Plain-JAX glue: binary (A+I) adjacency built directly in its final padded,
# narrow dtype, plus the D^-1/2 vector (degree of A+I, deduped multi-edges).
# ----------------------------------------------------------------------------
def build_adjacency(edge_index, num_nodes, n_pad, dtype):
    src, dst = edge_index[0], edge_index[1]
    a = jnp.zeros((n_pad, n_pad), dtype)
    a = a.at[dst, src].set(1)        # message flows src -> dst
    a = a.at[src, dst].set(1)        # symmetrize (undirected graph)
    idx = jnp.arange(num_nodes)
    a = a.at[idx, idx].set(1)        # self loops on real nodes only
    # NOTE: .at[].set dedups multi-edges; matches GCNConv iff no parallel edges.
    deg = jnp.sum(a, axis=1, dtype=jnp.float32)
    d_inv_sqrt = jnp.where(deg > 0, jax.lax.rsqrt(deg), 0.0)
    return a, d_inv_sqrt


# ----------------------------------------------------------------------------
# GNN forward: stack of GCN convs, ReLU (+eval-mode dropout=id) between layers.
# Nodes padded to a multiple of `tile` (tm == tk), features to 128 lanes.
# Padded rows have degree 0, so d^-1/2 = 0 zeroes them before aggregation —
# padding never leaks into real rows even though intermediate padded rows
# carry ReLU(bias) garbage.
# ----------------------------------------------------------------------------
def gnn_forward(x, edge_index, params, *, tile=512):
    assert tile % _LANE == 0
    n, f_in = x.shape
    num_layers = len(params)
    vmem_limit = _vmem_budget()

    tile = min(tile, _round_up(n, _LANE))      # both are multiples of 128
    n_pad = _round_up(n, tile)

    a_bin, d_inv_sqrt = build_adjacency(edge_index, n, n_pad, jnp.int8)
    dinv = d_inv_sqrt.reshape(n_pad, 1)

    f_in_pad = _round_up(f_in, _LANE)
    h = jnp.pad(x.astype(jnp.float32),
                ((0, n_pad - n), (0, f_in_pad - f_in))).astype(jnp.bfloat16)

    f_out = f_in
    for i, (w, b) in enumerate(params):
        f_cur_in, f_out = w.shape
        f_cur_in_pad = _round_up(f_cur_in, _LANE)
        f_out_pad = _round_up(f_out, _LANE)
        w_pad = jnp.pad(w.astype(jnp.float32),
                        ((0, f_cur_in_pad - f_cur_in), (0, f_out_pad - f_out))
                        ).astype(jnp.bfloat16)
        b_pad = jnp.pad(b.reshape(1, -1).astype(jnp.float32),
                        ((0, 0), (0, f_out_pad - f_out)))

        # Hoisted projection (once per layer) with folded right-hand D^-1/2.
        xw = project(h, w_pad, dinv, tile=tile, vmem_limit=vmem_limit)

        is_last = i == num_layers - 1
        out_dtype = jnp.float32 if is_last else jnp.bfloat16
        h = aggregate(a_bin, xw, dinv, b_pad, apply_relu=not is_last,
                      out_dtype=out_dtype, tile=tile, vmem_limit=vmem_limit)
        # dropout: identity in eval mode

    return h[:n, :f_out]


# ----------------------------------------------------------------------------
# Pure-JAX reference (f32) for validation, plus param init (xavier on 2-D).
# ----------------------------------------------------------------------------
def gnn_reference(x, edge_index, params):
    n = x.shape[0]
    a, d_inv_sqrt = build_adjacency(edge_index, n, n, jnp.float32)
    a_hat = a * d_inv_sqrt[:, None] * d_inv_sqrt[None, :]
    h = x.astype(jnp.float32)
    for i, (w, b) in enumerate(params):
        h = a_hat @ (h @ w) + b.reshape(1, -1)
        if i != len(params) - 1:
            h = jnp.maximum(h, 0.0)
    return h


def xavier_uniform(key, shape, dtype=jnp.float32):
    fan_in, fan_out = shape
    limit = jnp.sqrt(6.0 / (fan_in + fan_out))
    return jax.random.uniform(key, shape, dtype, minval=-limit, maxval=limit)


def init_params(key, dims):
    params = []
    for i in range(len(dims) - 1):
        key, wk = jax.random.split(key)
        w = xavier_uniform(wk, (dims[i], dims[i + 1]))
        b = jnp.zeros((dims[i + 1],), jnp.float32)
        params.append((w, b))
    return params


if __name__ == "__main__":
    key = jax.random.PRNGKey(0)

    # Small, deterministic example graph.  tile=128 with 300 nodes pads to
    # 384, giving a 3-step contraction axis (exercises the accumulator and
    # the resident-XW dynamic slicing).
    num_nodes = 300
    feat_in = 32
    hidden = 32
    feat_out = 32
    num_layers = 3
    num_edges = 600

    k_x, k_e, k_p = jax.random.split(key, 3)
    x = jax.random.normal(k_x, (num_nodes, feat_in), jnp.float32)
    edge_index = jax.random.randint(k_e, (2, num_edges), 0, num_nodes,
                                    dtype=jnp.int32)
    params = init_params(k_p, [feat_in] + [hidden] * (num_layers - 1) + [feat_out])

    out = jax.block_until_ready(gnn_forward(x, edge_index, params, tile=128))
    assert out.shape == (num_nodes, feat_out)
    assert bool(jnp.all(jnp.isfinite(out)))

    # Validate against the f32 reference (A is now exact; only H is bf16).
    ref = jax.block_until_ready(gnn_reference(x, edge_index, params))
    max_err = float(jnp.max(jnp.abs(out - ref)))
    scale = float(jnp.max(jnp.abs(ref))) + 1e-6
    assert max_err <= 0.05 * scale + 0.05, f"max_err={max_err}, scale={scale}"

    print("KERNEL_OK")
</pallas_src>

<mosaic_0001>
module attributes {stable_mosaic.version = 11 : i64} {
  func.func @_project_kernel(%arg0: i32, %arg1: memref<128x128xbf16, #tpu.memory_space<vmem>>, %arg2: memref<128x128xbf16, #tpu.memory_space<vmem>>, %arg3: memref<128x1xf32, #tpu.memory_space<vmem>>, %arg4: memref<128x128xbf16, #tpu.memory_space<vmem>>) attributes {dimension_semantics = [#tpu.dimension_semantics<parallel>], iteration_bounds = array<i64: 3>, scalar_prefetch = 0 : i64, scratch_operands = 0 : i64, tpu.core_type = #tpu.core_type<tc>, window_params = [{transform_indices = @transform_0, window_bounds = array<i64: 128, 128>}, {pipeline_mode = #tpu.pipeline_mode<synchronous>, transform_indices = @transform_1, window_bounds = array<i64: 128, 128>}, {transform_indices = @transform_2, window_bounds = array<i64: 128, 1>}, {transform_indices = @transform_3, window_bounds = array<i64: 128, 128>}]} {
    %c0 = arith.constant 0 : index
    %c0_0 = arith.constant 0 : index
    %0 = vector.load %arg1[%c0, %c0_0] : memref<128x128xbf16, #tpu.memory_space<vmem>>, vector<128x128xbf16>
    %c0_1 = arith.constant 0 : index
    %c0_2 = arith.constant 0 : index
    %1 = vector.load %arg2[%c0_1, %c0_2] : memref<128x128xbf16, #tpu.memory_space<vmem>>, vector<128x128xbf16>
    %cst = arith.constant dense<0.000000e+00> : vector<128x128xf32>
    %2 = tpu.matmul %0, %1, %cst {dimension_numbers = #tpu.dot_dimension_numbers<[1], [0], [0], [1], [0, 0, 1, 1], [], []>} : vector<128x128xbf16>, vector<128x128xbf16>, vector<128x128xf32> -> vector<128x128xf32>
    %c0_3 = arith.constant 0 : index
    %c0_4 = arith.constant 0 : index
    %3 = vector.load %arg3[%c0_3, %c0_4] : memref<128x1xf32, #tpu.memory_space<vmem>>, vector<128x1xf32>
    %4 = vector.broadcast %3 : vector<128x1xf32> to vector<128x128xf32>
    %5 = arith.mulf %2, %4 : vector<128x128xf32>
    %6 = arith.truncf %5 : vector<128x128xf32> to vector<128x128xbf16>
    %c0_5 = arith.constant 0 : index
    %c0_6 = arith.constant 0 : index
    %7 = vector.load %arg4[%c0_5, %c0_6] : memref<128x128xbf16, #tpu.memory_space<vmem>>, vector<128x128xbf16>
    tpu.vector_store %arg4[%c0_5, %c0_6], %6 {strides = array<i32>} : memref<128x128xbf16, #tpu.memory_space<vmem>>, vector<128x128xbf16>,
    return
  }
  func.func @transform_0(%arg0: i32) -> (i32, i32) {
    %c0_i32 = arith.constant 0 : i32
    %c0_i32_0 = arith.constant 0 : i32
    return %arg0, %c0_i32 : i32, i32
  }
  func.func @transform_1(%arg0: i32) -> (i32, i32) {
    %c0_i32 = arith.constant 0 : i32
    %c0_i32_0 = arith.constant 0 : i32
    %c0_i32_1 = arith.constant 0 : i32
    return %c0_i32, %c0_i32_0 : i32, i32
  }
  func.func @transform_2(%arg0: i32) -> (i32, i32) {
    %c0_i32 = arith.constant 0 : i32
    %c0_i32_0 = arith.constant 0 : i32
    return %arg0, %c0_i32 : i32, i32
  }
  func.func @transform_3(%arg0: i32) -> (i32, i32) {
    %c0_i32 = arith.constant 0 : i32
    %c0_i32_0 = arith.constant 0 : i32
    return %arg0, %c0_i32 : i32, i32
  }
}

</mosaic_0001>

<bundles_post_ra>
// kernel: tpu_custom_call.1
= control target key start
LH: loop header
LB: loop body
LE: loop exit
PB: predicated region body
PF: predicated region fallthrough
CT: control target
= control target key end

     0   :  { %8 = vsyncpa [#allocation3], 0  ;;  %s1194_s0 = inlined_call_operand.vmem [shape: bf16[384,128], index: 0, kind: input, shape index: {}]   ;;  %s1195_s1 = inlined_call_operand.vmem [shape: bf16[128,128], index: 1, kind: input, shape index: {}]   ;;  %s1196_s2 = inlined_call_operand.vmem [shape: f32[384,1], index: 2, kind: input, shape index: {}]   ;;  %s1197_s3 = inlined_call_operand.hbm [shape: bf16[384,128], index: 3, kind: output, shape index: {}]  }
   0x1   :  { %10 = vsyncpa [#allocation3 + $0x1], 0  ;;  %s1022_s12 = smov 0   ;;  %s1024_s13 = smov 0  }
   0x2   :  { %s1026_s14 = smov 0   ;;  %s1028_s15 = smov 0  }
   0x3 LB: > { %s1043_s16 = sadd.s32 4294967295, %s996_s15   ;;  %s700_s17 = sadd.s32 4294967294, %s996_s15   ;;  %s996_s15 = sphi %s1028_s15, %s1203_s15   ;;  %s992_s14 = sphi %s1026_s14, %s1202_s14   ;;  %s988_s13 = sphi %s1024_s13, %s1201_s13   ;;  %s984_s12 = sphi %s1022_s12, %s1200_s12  }
   0x4   : > { %s1047_s18 = sadd.s32 1, %s996_s15   ;;  %s96_s19 = sadd.s32 1, %s992_s14 }
   0x5   : > { %s93_s20 = ssub.s32 %s996_s15, %s1047_s18  ;;  %p106_p0 = scmp.ne.s32.totalorder %s992_s14, %s988_s13 }
   0x6   : > { %p94_p1 = scmp.eq.s32.totalorder %s93_s20, 0  ;;  %p107_p2 = scmp.eq.s32.totalorder %s1043_s16, 2 }
   0x7   : > { %p112_p3 = scmp.ne.s32.totalorder %s988_s13, %s984_s12  ;;  %p113_p4 = scmp.eq.s32.totalorder %s700_s17, 2 }
   0x8   : > { %s1058_s21 = scalar_select %p94_p1, %s992_s14, %s96_s19  }
   0x9   : > { %p1060_p5 = por %p107_p2, %p106_p0  ;;  %p1064_p6 = por %p113_p4, %p112_p3 }
   0xa   : > { %p703_p7 = scmp.ge.s32.totalorder %s996_s15, 1  ;;  %p152_p8 = scmp.lt.s32.totalorder %s996_s15, 4 }
   0xc   : > { %p153_p9 = pnand %p703_p7, %p152_p8 }
   0xd   : > { %v918_v0 = vld [vmem:[%s1195_s1] sm:$0xff] (!%p153_p9)   ;;  %s705_s26 = sshll.u32 (!%p153_p9), %s1043_s16, 4  ;;  %v919_v1 = vld [vmem:[%s1195_s1 + $0x8] sm:$0xff] (!%p153_p9)   ;;  %v920_v2 = vld [vmem:[%s1195_s1 + $0x10] sm:$0xff] (!%p153_p9)   ;;  %v998_v3 = vmov (!%p153_p9), 0   ;;  %s999_s19 = smov (!%p153_p9), [#allocation2]  }
   0xe   : > { %156 = sbr.rel (%p153_p9) target bundleno = 288 (0x120), region = 32  ;;  %p182_p10 = scmp.lt.s32.totalorder (!%p153_p9), %s705_s26, 47  ;;  %826 = vmatprep.subr.bf16.mxu0 (!%p153_p9), %v918_v0  ;;  %858 = vmatprep.subr.bf16.mxu1 (!%p153_p9), %v918_v0  ;;  %v921_v4 = vld [vmem:[%s1195_s1 + $0x18] sm:$0xff] (!%p153_p9)   ;;  %v922_v7 = vld [vmem:[%s1195_s1 + $0x20] sm:$0xff] (!%p153_p9)   ;;  %v923_v8 = vld [vmem:[%s1195_s1 + $0x28] sm:$0xff] (!%p153_p9)  }
   0xf   : > { %827 = vmatpush3.bf16.msra.mxu0 (!%p153_p9), %v918_v0  ;;  %866 = vmatpush3.bf16.msra.mxu1 (!%p153_p9), %v918_v0  ;;  %v924_v13 = vld [vmem:[%s1195_s1 + $0x30] sm:$0xff] (!%p153_p9)   ;;  %v925_v16 = vld [vmem:[%s1195_s1 + $0x38] sm:$0xff] (!%p153_p9)   ;;  %s938_s20 = sshll.u32 (!%p153_p9), %s999_s19, 4  ;;  %s939_s20 = int_to_ptr.vmem [resolvable:$false] %s938_s20 }
  0x10   : > { %828 = vmatprep.subr.bf16.mxu0 (!%p153_p9), %v919_v1  ;;  %859 = vmatprep.subr.bf16.mxu1 (!%p153_p9), %v919_v1 }
  0x11   : > { %917 = vset.pattern.permute.xlu1 (!%p153_p9), %v998_v3  ;;  %916 = vset.pattern.permute.xlu0 (!%p153_p9), %v998_v3 }
  0x13   : > { %829 = vmatpush3.bf16.msra.mxu0 (!%p153_p9), %v919_v1  ;;  %867 = vmatpush3.bf16.msra.mxu1 (!%p153_p9), %v919_v1 }
  0x14   : > { %830 = vmatprep.subr.bf16.mxu0 (!%p153_p9), %v920_v2  ;;  %860 = vmatprep.subr.bf16.mxu1 (!%p153_p9), %v920_v2 }
  0x15   : > { %s1205_s26 = smov (!%p182_p10, %s705_s26), 47 }
  0x16   : > { %s706_s4 = sshll.u32 %s1205_s26, 2  ;;  %s708_s10 = sshll.u32 %s1205_s26, 3 }
  0x17   : > { %s1083_s7 = scalar_lea.vmem %s1194_s0, %s706_s4  ;;  %831 = vmatpush3.bf16.msra.mxu0 %v920_v2  ;;  %868 = vmatpush3.bf16.msra.mxu1 %v920_v2  ;;  %s1096_s24 = scalar_lea.vmem %s1196_s2, %s708_s10 }
  0x18   : > { %v926_v5 = vld [vmem:[%s1083_s7] sm:$0xff]   ;;  %832 = vmatprep.subr.bf16.mxu0 %v921_v4  ;;  %861 = vmatprep.subr.bf16.mxu1 %v921_v4  ;;  %v422_v9 = vld [vmem:[%s1096_s24 + $0x10] sm:$0xff]  ;;  %v423_v11 = vld [vmem:[%s1096_s24 + $0x18] sm:$0xff]  ;;  %s178_s4 = sand.u32 1, %s988_s13  }
  0x19   : > { %v927_v6 = vld [vmem:[%s1083_s7 + $0x20] sm:$0xff]   ;;  %842 = vmatprep.mubr.bf16.mxu0 %v926_v5  ;;  %448 = vperm.xlu1 %917, %v422_v9   ;;  %v421_v12 = vld [vmem:[%s1096_s24 + $0x8] sm:$0xff]  ;;  %v427_v17 = vld [vmem:[%s1096_s24 + $0x38] sm:$0xff]  ;;  %s704_s5 = sshll.u32 %s178_s4, 6  ;;  %s1153_s11 = scalar_lea.sflag [#allocation3], %s178_s4 }
  0x1a   : > { %850 = vmatprep.mubr.bf16.mxu1 %v927_v6  ;;  %v420_v10 = vld [vmem:[%s1096_s24] sm:$0xff]  ;;  %v425_v14 = vld [vmem:[%s1096_s24 + $0x28] sm:$0xff]  ;;  %v426_v18 = vld [vmem:[%s1096_s24 + $0x30] sm:$0xff]  ;;  %s1132_s6 = scalar_lea.vmem [#allocation2], %s704_s5 }
  0x1b   : > { %833 = vmatpush3.bf16.msra.mxu0 %v921_v4  ;;  %869 = vmatpush3.bf16.msra.mxu1 %v921_v4  ;;  %v424_v15 = vld [vmem:[%s1096_s24 + $0x20] sm:$0xff]  ;;  %v928_v19 = vld [vmem:[%s1083_s7 + $0x8] sm:$0xff]   ;;  %v930_v23 = vld [vmem:[%s1083_s7 + $0x10] sm:$0xff]   ;;  %s626_s8 = sshll.u32 %s1132_s6, 4  ;;  %s1145_s8 = int_to_ptr.vmem [resolvable:$true] %s626_s8 }
  0x1c   : > { %834 = vmatprep.subr.bf16.mxu0 %v922_v7  ;;  %862 = vmatprep.subr.bf16.mxu1 %v922_v7  ;;  %v929_v20 = vld [vmem:[%s1083_s7 + $0x28] sm:$0xff]   ;;  %v428_v22 = vld [vmem:[%s1096_s24 + $0x40] sm:$0xff]  ;;  %v931_v24 = vld [vmem:[%s1083_s7 + $0x30] sm:$0xff]   ;;  %s934_s17 = scalar_lea.vmem %s1145_s8, 1024  ;;  %p941_p0 = scmp.lt.s32.totalorder %s1145_s8, %s939_s20 }
  0x1d   : > { %438 = vperm.xlu0 %916, %v420_v10   ;;  %453 = vperm.xlu1 %917, %v423_v11   ;;  %v429_v21 = vld [vmem:[%s1096_s24 + $0x48] sm:$0xff]  ;;  %v431_v25 = vld [vmem:[%s1096_s24 + $0x58] sm:$0xff]  ;;  %v430_v26 = vld [vmem:[%s1096_s24 + $0x50] sm:$0xff]  ;;  %p935_p11 = scmp.ne.s32.totalorder %s1145_s8, %s934_s17 }
  0x1e   : > { %v932_v27 = vld [vmem:[%s1083_s7 + $0x18] sm:$0xff]   ;;  %v433_v29 = vld [vmem:[%s1096_s24 + $0x68] sm:$0xff]  ;;  %v432_v30 = vld [vmem:[%s1096_s24 + $0x60] sm:$0xff] }
  0x1f   : > { %835 = vmatpush3.bf16.msra.mxu0 %v922_v7  ;;  %870 = vmatpush3.bf16.msra.mxu1 %v922_v7  ;;  %v933_v28 = vld [vmem:[%s1083_s7 + $0x38] sm:$0xff]   ;;  %v434_v32 = vld [vmem:[%s1096_s24 + $0x70] sm:$0xff]  ;;  %s762_s7 = sshll.u32 %s1043_s16, 10  ;;  %p936_p12 = pnand %p935_p11, %p1060_p5 }
  0x20   : > { %836 = vmatprep.subr.bf16.mxu0 %v923_v8  ;;  %863 = vmatprep.subr.bf16.mxu1 %v923_v8  ;;  %v435_v31 = vld [vmem:[%s1096_s24 + $0x78] sm:$0xff]  ;;  %s1143_s10 = scalar_lea.hbm %s1197_s3, %s762_s7  ;;  %s940_s24 = scalar_lea.vmem %s939_s20, 2048 }
  0x21   : > { %443 = vperm.xlu0 %916, %v421_v12   ;;  %463 = vperm.xlu1 %917, %v425_v14   ;;  %p937_p13 = pneg %p936_p12  ;;  %p942_p1 = scmp.lt.s32.totalorder %s940_s24, %s934_s17 }
  0x23   : > { %837 = vmatpush3.bf16.msra.mxu0 %v923_v8  ;;  %871 = vmatpush3.bf16.msra.mxu1 %v923_v8  ;;  %p943_p2 = por %p942_p1, %p941_p0 }
  0x24   : > { %838 = vmatprep.subr.bf16.mxu0 %v924_v13  ;;  %864 = vmatprep.subr.bf16.mxu1 %v924_v13 }
  0x25   : > { %458 = vperm.xlu0 %916, %v424_v15   ;;  %473 = vperm.xlu1 %917, %v427_v17   ;;  %p944_p3 = pnand %p943_p2, %p937_p13 }
  0x27   : > { %839 = vmatpush3.bf16.msra.mxu0 %v924_v13  ;;  %872 = vmatpush3.bf16.msra.mxu1 %v924_v13 }
  0x28   : > { %840 = vmatprep.subr.bf16.mxu0 %v925_v16  ;;  %865 = vmatprep.subr.bf16.mxu1 %v925_v16 }
  0x29   : > { %468 = vperm.xlu0 %916, %v426_v18   ;;  %483 = vperm.xlu1 %917, %v429_v21  }
  0x2b   : > { %841 = vmatpush3.bf16.msra.mxu0 %v925_v16  ;;  %873 = vmatpush3.bf16.msra.mxu1 %v925_v16 }
  0x2d   : > { %478 = vperm.xlu0 %916, %v428_v22   ;;  %493 = vperm.xlu1 %917, %v431_v25  }
  0x2e   : > { %843 = vmatmul.mubr.bf16.vlgmr.msra.gmra.mrb[0].mxu0 %v928_v19  ;;  %851 = vmatmul.mubr.bf16.vlgmr.msra.gmra.mrb[0].mxu1 %v929_v20 }
  0x2f   : > { %846 = vmatprep.mubr.bf16.mxu0 %v930_v23  ;;  %854 = vmatprep.mubr.bf16.mxu1 %v931_v24 }
  0x31   : > { %488 = vperm.xlu0 %916, %v430_v26   ;;  %503 = vperm.xlu1 %917, %v433_v29  }
  0x35   : > { %498 = vperm.xlu0 %916, %v432_v30   ;;  %513 = vperm.xlu1 %917, %v435_v31  }
  0x36   : > { %847 = vmatmul.mubr.bf16.gmra.mrb[4].mxu0 %v932_v27  ;;  %855 = vmatmul.mubr.bf16.gmra.mrb[4].mxu1 %v933_v28 }
  0x39   : > { %508 = vperm.xlu0 %916, %v434_v32  }
  0x98   : > { %v449_v33 = vpop.permute.xlu1 %448 }
  0x9c   : > { %v439_v34 = vpop.permute.xlu0 %438  ;;  %v454_v35 = vpop.permute.xlu1 %453 }
  0xa0   : > { %v444_v36 = vpop.permute.xlu0 %443  ;;  %v464_v37 = vpop.permute.xlu1 %463 }
  0xa4   : > { %v459_v38 = vpop.permute.xlu0 %458  ;;  %v474_v39 = vpop.permute.xlu1 %473 }
  0xa8   : > { %v469_v40 = vpop.permute.xlu0 %468  ;;  %v484_v41 = vpop.permute.xlu1 %483 }
  0xac   : > { %v479_v42 = vpop.permute.xlu0 %478  ;;  %v494_v43 = vpop.permute.xlu1 %493 }
  0xb0   : > { %v489_v44 = vpop.permute.xlu0 %488  ;;  %v504_v45 = vpop.permute.xlu1 %503 }
  0xb4   : > { %v499_v46 = vpop.permute.xlu0 %498  ;;  %v514_v3 = vpop.permute.xlu1 %513 }
  0xb8   : > { %v509_v4 = vpop.permute.xlu0 %508 }
 0x101   : > { %v844_v47 = vpop.f32.mrb[0].mxu0  ;;  %v852_v48 = vpop.f32.mrb[0].mxu1 }
 0x102   : > { %v357_v49 = vpop.f32.mrb[1].mxu0  ;;  %v389_v50 = vpop.f32.mrb[1].mxu1  ;;  %v518_v53 = vmul.f32 %v844_v47, %v449_v33  ;;  %v526_v54 = vmul.f32 %v852_v48, %v489_v44 }
 0x103   : > { %v845_v51 = vpop.f32.mrb[2].mxu0  ;;  %v853_v52 = vpop.f32.mrb[2].mxu1  ;;  %v516_v59 = vmul.f32 %v439_v34, %v357_v49  ;;  %v524_v60 = vmul.f32 %v479_v42, %v389_v50 }
 0x104   : > { %v519_v55 = vmul.f32 %v845_v51, %v454_v35  ;;  %v527_v56 = vmul.f32 %v853_v52, %v494_v43  ;;  %v360_v57 = vpop.f32.mrb[3].mxu0  ;;  %v392_v58 = vpop.f32.mrb[3].mxu1 }
 0x105   : > { %v517_v61 = vmul.f32 %v444_v36, %v360_v57  ;;  %v525_v62 = vmul.f32 %v484_v41, %v392_v58 }
 0x106   : > { %v771_v63 = vpack.c.bf16 %v519_v55, %v518_v53  ;;  %v791_v0 = vpack.c.bf16 %v527_v56, %v526_v54 }
 0x107   : > { %v766_v1 = vpack.c.bf16 %v517_v61, %v516_v59  ;;  %v786_v2 = vpack.c.bf16 %v525_v62, %v524_v60 }
 0x108   : > { %803 = vst [vmem:[%s1132_s6 + $0x8] sm:$0xff] %v771_v63   ;;  %807 = vst [vmem:[%s1132_s6 + $0x28] sm:$0xff] %v791_v0  }
 0x109   : > { %767 = vst [vmem:[%s1132_s6] sm:$0xff] %v766_v1   ;;  %806 = vst [vmem:[%s1132_s6 + $0x20] sm:$0xff] %v786_v2   ;;  %v848_v5 = vpop.f32.mrb[4].mxu0  ;;  %v856_v6 = vpop.f32.mrb[4].mxu1 }
 0x10a   : > { %v373_v7 = vpop.f32.mrb[5].mxu0  ;;  %v405_v8 = vpop.f32.mrb[5].mxu1  ;;  %v522_v11 = vmul.f32 %v848_v5, %v469_v40  ;;  %v530_v12 = vmul.f32 %v856_v6, %v509_v4 }
 0x10b   : > { %v849_v9 = vpop.f32.mrb[6].mxu0  ;;  %v857_v10 = vpop.f32.mrb[6].mxu1  ;;  %v520_v17 = vmul.f32 %v459_v38, %v373_v7  ;;  %v528_v18 = vmul.f32 %v499_v46, %v405_v8 }
 0x10c   : > { %v523_v13 = vmul.f32 %v849_v9, %v474_v39  ;;  %v531_v14 = vmul.f32 %v857_v10, %v514_v3  ;;  %v376_v15 = vpop.f32.mrb[7].mxu0  ;;  %v408_v16 = vpop.f32.mrb[7].mxu1 }
 0x10d   : > { %v521_v19 = vmul.f32 %v464_v37, %v376_v15  ;;  %v529_v20 = vmul.f32 %v504_v45, %v408_v16 }
 0x10e   : > { %v781_v21 = vpack.c.bf16 %v523_v13, %v522_v11  ;;  %v801_v22 = vpack.c.bf16 %v531_v14, %v530_v12 }
 0x10f   : > { %v776_v23 = vpack.c.bf16 %v521_v19, %v520_v17  ;;  %v796_v24 = vpack.c.bf16 %v529_v20, %v528_v18 }
 0x110   : > { %805 = vst [vmem:[%s1132_s6 + $0x18] sm:$0xff] %v781_v21   ;;  %809 = vst [vmem:[%s1132_s6 + $0x38] sm:$0xff] %v801_v22  }
 0x111   : > { %804 = vst [vmem:[%s1132_s6 + $0x10] sm:$0xff] %v776_v23   ;;  %808 = vst [vmem:[%s1132_s6 + $0x30] sm:$0xff] %v796_v24  }
 0x112   : > { %947 = shalt.err (!%p944_p3)
}
 0x113   : > { %s948_s25 = scalar_lea.hbm %s1143_s10, 1024  ;;  %s952_s28 = scalar_lea.hbm %s1197_s3, 3072 }
 0x114   : > { %p949_p4 = scmp.ne.s32.totalorder %s1143_s10, %s948_s25  ;;  %p953_p9 = scmp.lt.u32.totalorder %s1143_s10, %s1197_s3 }
 0x115   : > { %p954_p10 = scmp.lt.u32.totalorder %s952_s28, %s948_s25  ;;  %p956_p12 = scmp.lt.u32.totalorder %s948_s25, %s1143_s10 }
 0x116   : > { %p950_p7 = pnand %p949_p4, %p1060_p5 }
 0x117   : > { %p955_p11 = por %p954_p10, %p953_p9 }
 0x118   : > { %p951_p8 = pneg %p950_p7 }
 0x119   : > { %p957_p13 = por %p956_p12, %p955_p11 }
 0x11b   : > { %p958_p0 = pnand %p957_p13, %p951_p8 }
 0x11d   : > { %961 = shalt.err (!%p958_p0)
}
 0x11e   : > { %s1000_s4 = smov 64   ;;  %s1001_s5 = smov 4  }
 0x11f   : > { %874 = dma.vmem_to_hbm [thread:$0]  (%p1060_p5), %s1145_s8, 1024, %s1143_s10, %s1153_s11, %s1000_s4, %s1000_s4, %s1001_s5  }
 0x120 PF: > { %p880_p1 = scmp.ge.s32.totalorder %s996_s15, 2  ;;  %s641_s6 = sand.u32 1, %s984_s12  }
 0x121   : > { %s642_s7 = scalar_lea.sflag [#allocation3], %s641_s6 }
 0x122   : > { %p877_p2 = pnand %p880_p1, %p1064_p6 }
 0x124   : > { %979 = dma.done.wait (!%p877_p2), %s642_s7, 1024  }
 0x125   : > { %981 = vsyncadd (!%p877_p2), %s642_s7, 4294966272  ;;  %p13_p3 = scmp.ge.s32.totalorder %s1047_s18, 5   ;;  %s1200_s12 = smov %s988_s13 }
 0x126   : > { %s1201_s13 = smov %s992_s14  ;;  %s1202_s14 = smov %s1058_s21 }
 0x127   : > { %s1203_s15 = smov %s1047_s18  ;;  %15 = sbr.rel (!%p13_p3) target bundleno = 3 (0x3), region = 70 }
 0x12e   :  { %647 = vsyncpa [#allocation3], 1 }
 0x12f   :  { %649 = vsyncpa [#allocation3 + $0x1], 1 }

</bundles_post_ra>
